<compile_context>
chip_gen: v6e
topology: v6e:2x2x1
jax: 0.10.0
libtpu: 0.0.40
codegen_flags: <defaults>
</compile_context>

<pallas_src>
import jax
import jax.numpy as jnp
from jax.experimental import pallas as pl
from jax.experimental.pallas import tpu as pltpu


def _round_up(x, m):
    return ((x + m - 1) // m) * m


def _vmem_capacity_bytes():
    """Physical VMEM per TensorCore; conservative v7x fallback (64 MiB)."""
    try:
        return int(pltpu.get_tpu_info().vmem_capacity_bytes)
    except Exception:
        return 64 * 1024 * 1024


def _attention_kernel(q_ref, k_ref, wq_ref, wk_ref, b_ref, h_ref,
                      vec_ref, wgt_ref):
    # q_ref  : (BB, D)      bf16 queries for this batch block
    # k_ref  : (BB, T, H)   bf16 keys for this batch block
    # wq_ref : (D, Hp)      bf16  W[:, :D].T, lane-padded to Hp
    # wk_ref : (H, Hp)      bf16  W[:, D:].T, lane-padded to Hp
    # b_ref  : (1, Hp)      f32 projection bias (zero in padded lanes)
    # h_ref  : (1, Hp)      f32 attention vector h (zero in padded lanes)
    # vec_ref: (BB, H)      f32 aggregated output ('sum' over time)
    # wgt_ref: (BB, T)      f32 softmax attention weights
    BB, T, H = k_ref.shape
    Hp = wk_ref.shape[-1]

    k = k_ref[...]                                   # (BB, T, H) bf16
    q = q_ref[...]                                   # (BB, D)    bf16

    # project_weight(cat(query_expanded, key)) + bias, then ReLU.
    # Key half as one big (BB*T, H) x (H, Hp) bf16 MXU matmul (f32 acc);
    # query half is a (BB, D) x (D, Hp) matmul broadcast over T.
    # The reshape back is layout-preserving because Hp % 128 == 0; the forward
    # flatten only relayouts when H % 128 != 0.
    kf = k.reshape(BB * T, H)
    proj_k = jnp.dot(kf, wk_ref[...], preferred_element_type=jnp.float32)
    proj_q = jnp.dot(q, wq_ref[...], preferred_element_type=jnp.float32)
    proj = proj_k.reshape(BB, T, Hp) + proj_q[:, None, :] + b_ref[...]
    proj = jnp.maximum(proj, 0.0)                    # relu (f32, VPU, lane-dense)

    # attention_alpha = proj @ h  -> VPU multiply + lane reduction.  Padded
    # lanes of h are zero so they contribute nothing.
    alpha = jnp.sum(proj * h_ref[...], axis=-1)      # (BB, T) f32

    # softmax over the time axis (dim=1 in PyTorch); EUP reciprocal instead of
    # a VPU divide.
    m = jnp.max(alpha, axis=-1, keepdims=True)
    e = jnp.exp(alpha - m)
    denom = jnp.sum(e, axis=-1, keepdims=True)
    w = e * pl.reciprocal(denom, approx=True)        # (BB, T) f32

    # attention_vec = sum_t key * weight ('sum' aggregation), f32 accumulate.
    vec = jnp.sum(k.astype(jnp.float32) * w[:, :, None], axis=1)   # (BB, H)

    vec_ref[...] = vec
    wgt_ref[...] = w


def attention_forward(query, key, W, b, h_param, *, stream_dtype=jnp.bfloat16):
    """query: (B, D), key: (B, T, H).
    W: (H, D + H) PyTorch-layout Linear weight, b: (H,), h_param: (H, 1).
    Returns (attention_vec (B, H) f32, attention_weight (B, T, 1) f32)."""
    B, T, H = key.shape
    D = query.shape[-1]
    Hp = _round_up(H, 128)
    itemsize = jnp.dtype(stream_dtype).itemsize

    # ---- weights: split the Linear(D+H -> H) weight, transpose, lane-pad ----
    wq_t = jnp.pad(jnp.transpose(W[:, :D]), ((0, 0), (0, Hp - H))).astype(stream_dtype)
    wk_t = jnp.pad(jnp.transpose(W[:, D:]), ((0, 0), (0, Hp - H))).astype(stream_dtype)
    b_row = jnp.pad(b.reshape(1, H).astype(jnp.float32), ((0, 0), (0, Hp - H)))
    h_row = jnp.pad(h_param.reshape(1, H).astype(jnp.float32), ((0, 0), (0, Hp - H)))

    # ---- batch block size from a per-generation VMEM budget -----------------
    vmem_cap = _vmem_capacity_bytes()
    budget = int(0.40 * vmem_cap)          # leave headroom for double buffers etc.
    # Approximate per-batch-row VMEM working set (bytes):
    #   double-buffered bf16 key tile (+ possible flatten relayout)  ~ 5*T*H*isz
    #   f32 proj matmul result + broadcast/relu temp                 ~ 8*T*Hp
    #   f32 key cast + weighted-product temps                        ~ 8*T*H
    bytes_per_row = (T * (5 * H * itemsize + 8 * Hp + 8 * H)
                     + 4 * (D + 2 * Hp + H + T))
    bb_fit = max(8, (budget // max(bytes_per_row, 1)) // 8 * 8)

    min_blocks = 2 if B > 8 else 1         # keep both v7x TensorCores busy
    num_blocks = max(min_blocks, -(-B // bb_fit))
    BB = _round_up(-(-B // num_blocks), 8)  # balanced padding, multiple of 8
    num_blocks = -(-B // BB)
    B_pad = num_blocks * BB

    # ---- inputs: bf16 stream, zero-pad dead batch rows (finite softmax) ------
    q_s = query.astype(stream_dtype)
    k_s = key.astype(stream_dtype)
    if B_pad != B:
        q_s = jnp.pad(q_s, ((0, B_pad - B), (0, 0)))
        k_s = jnp.pad(k_s, ((0, B_pad - B), (0, 0), (0, 0)))

    grid_spec = pltpu.PrefetchScalarGridSpec(
        num_scalar_prefetch=0,
        grid=(num_blocks,),
        in_specs=[
            pl.BlockSpec((BB, D), lambda i: (i, 0)),         # query (bf16)
            pl.BlockSpec((BB, T, H), lambda i: (i, 0, 0)),   # key   (bf16)
            pl.BlockSpec((D, Hp), lambda i: (0, 0)),         # W_q^T (bf16)
            pl.BlockSpec((H, Hp), lambda i: (0, 0)),         # W_k^T (bf16)
            pl.BlockSpec((1, Hp), lambda i: (0, 0)),         # bias  (f32)
            pl.BlockSpec((1, Hp), lambda i: (0, 0)),         # h row (f32)
        ],
        out_specs=[
            pl.BlockSpec((BB, H), lambda i: (i, 0)),         # attention_vec
            pl.BlockSpec((BB, T), lambda i: (i, 0)),         # attention_weight
        ],
    )

    flops = (2 * B_pad * T * H * Hp        # key projection matmul
             + 2 * B_pad * D * Hp          # query projection matmul
             + 2 * B_pad * T * Hp          # h contraction
             + 2 * B_pad * T * H           # weighted sum
             + 6 * B_pad * T)              # softmax elementwise
    bytes_accessed = int((B_pad * T * H + B_pad * D + (D + H) * Hp) * itemsize
                         + 2 * Hp * 4
                         + (B_pad * H + B_pad * T) * 4)
    cost = pl.CostEstimate(flops=flops,
                           transcendentals=B_pad * T + B_pad,
                           bytes_accessed=bytes_accessed)

    vec, wgt = pl.pallas_call(
        _attention_kernel,
        out_shape=(
            jax.ShapeDtypeStruct((B_pad, H), jnp.float32),
            jax.ShapeDtypeStruct((B_pad, T), jnp.float32),
        ),
        grid_spec=grid_spec,
        compiler_params=pltpu.CompilerParams(
            dimension_semantics=("parallel",),
            vmem_limit_bytes=int(0.75 * vmem_cap)),
        cost_estimate=cost,
    )(q_s, k_s, wq_t, wk_t, b_row, h_row)

    return vec[:B], wgt[:B].reshape(B, T, 1)


def attention_reference(query, key, W, b, h_param):
    """Pure-JAX f32 transcription of the PyTorch forward (agg_type='sum')."""
    B, T, H = key.shape
    D = query.shape[-1]
    q = jnp.broadcast_to(query.reshape(B, 1, D), (B, T, D))
    cat = jnp.concatenate([q, key], axis=-1)                  # (B, T, D+H)
    proj = jnp.maximum(jnp.einsum('btc,hc->bth', cat, W) + b, 0.0)
    alpha = jnp.einsum('bth,ho->bto', proj, h_param)          # (B, T, 1)
    weight = jax.nn.softmax(alpha, axis=1)
    vec = jnp.sum(key * weight, axis=1)                       # (B, H)
    return vec, weight


if __name__ == "__main__":
    B, T, H = 2, 8, 32
    D = H  # query dim == hidden (project_weight = Linear(hidden*2, hidden))

    key0 = jax.random.PRNGKey(0)
    k_q, k_k, k_w, k_b, k_h = jax.random.split(key0, 5)

    query = jax.random.normal(k_q, (B, D), dtype=jnp.float32)
    key_t = jax.random.normal(k_k, (B, T, H), dtype=jnp.float32)

    # Deterministic synthetic parameters (shapes from __init__).
    W = jax.random.normal(k_w, (H, 2 * H), dtype=jnp.float32) * 0.1  # project_weight.weight
    b = jax.random.normal(k_b, (H,), dtype=jnp.float32) * 0.1        # project_weight.bias
    h_param = jax.random.uniform(k_h, (H, 1), dtype=jnp.float32)     # self.h

    vec, wgt = attention_forward(query, key_t, W, b, h_param)
    jax.block_until_ready((vec, wgt))

    vec_ref, wgt_ref = attention_reference(query, key_t, W, b, h_param)

    # Tolerances loosened vs the pure-f32 version: the key/query/weights are
    # streamed in bf16 and the softmax uses an approximate EUP reciprocal.
    assert vec.shape == (B, H) and wgt.shape == (B, T, 1)
    assert jnp.allclose(vec, vec_ref, atol=5e-2, rtol=5e-2)
    assert jnp.allclose(wgt, wgt_ref, atol=5e-2, rtol=5e-2)

    print("KERNEL_OK")
</pallas_src>

<mosaic_0001>
module attributes {stable_mosaic.version = 11 : i64} {
  func.func @_attention_kernel(%arg0: i32, %arg1: memref<8x32xbf16, #tpu.memory_space<vmem>>, %arg2: memref<8x8x32xbf16, #tpu.memory_space<vmem>>, %arg3: memref<32x128xbf16, #tpu.memory_space<vmem>>, %arg4: memref<32x128xbf16, #tpu.memory_space<vmem>>, %arg5: memref<1x128xf32, #tpu.memory_space<vmem>>, %arg6: memref<1x128xf32, #tpu.memory_space<vmem>>, %arg7: memref<8x32xf32, #tpu.memory_space<vmem>>, %arg8: memref<8x8xf32, #tpu.memory_space<vmem>>) attributes {dimension_semantics = [#tpu.dimension_semantics<parallel>], iteration_bounds = array<i64: 1>, scalar_prefetch = 0 : i64, scratch_operands = 0 : i64, tpu.core_type = #tpu.core_type<tc>, window_params = [{transform_indices = @transform_0, window_bounds = array<i64: 8, 32>}, {transform_indices = @transform_1, window_bounds = array<i64: 8, 8, 32>}, {pipeline_mode = #tpu.pipeline_mode<synchronous>, transform_indices = @transform_2, window_bounds = array<i64: 32, 128>}, {pipeline_mode = #tpu.pipeline_mode<synchronous>, transform_indices = @transform_3, window_bounds = array<i64: 32, 128>}, {pipeline_mode = #tpu.pipeline_mode<synchronous>, transform_indices = @transform_4, window_bounds = array<i64: 1, 128>}, {pipeline_mode = #tpu.pipeline_mode<synchronous>, transform_indices = @transform_5, window_bounds = array<i64: 1, 128>}, {transform_indices = @transform_6, window_bounds = array<i64: 8, 32>}, {transform_indices = @transform_7, window_bounds = array<i64: 8, 8>}]} {
    %c0 = arith.constant 0 : index
    %c0_0 = arith.constant 0 : index
    %c0_1 = arith.constant 0 : index
    %0 = vector.load %arg2[%c0, %c0_0, %c0_1] : memref<8x8x32xbf16, #tpu.memory_space<vmem>>, vector<8x8x32xbf16>
    %c0_2 = arith.constant 0 : index
    %c0_3 = arith.constant 0 : index
    %1 = vector.load %arg1[%c0_2, %c0_3] : memref<8x32xbf16, #tpu.memory_space<vmem>>, vector<8x32xbf16>
    %2 = vector.shape_cast %0 : vector<8x8x32xbf16> to vector<64x32xbf16>
    %c0_4 = arith.constant 0 : index
    %c0_5 = arith.constant 0 : index
    %3 = vector.load %arg4[%c0_4, %c0_5] : memref<32x128xbf16, #tpu.memory_space<vmem>>, vector<32x128xbf16>
    %cst = arith.constant dense<0.000000e+00> : vector<64x128xf32>
    %4 = tpu.matmul %2, %3, %cst {dimension_numbers = #tpu.dot_dimension_numbers<[1], [0], [0], [1], [0, 0, 1, 1], [], []>} : vector<64x32xbf16>, vector<32x128xbf16>, vector<64x128xf32> -> vector<64x128xf32>
    %c0_6 = arith.constant 0 : index
    %c0_7 = arith.constant 0 : index
    %5 = vector.load %arg3[%c0_6, %c0_7] : memref<32x128xbf16, #tpu.memory_space<vmem>>, vector<32x128xbf16>
    %cst_8 = arith.constant dense<0.000000e+00> : vector<8x128xf32>
    %6 = tpu.matmul %1, %5, %cst_8 {dimension_numbers = #tpu.dot_dimension_numbers<[1], [0], [0], [1], [0, 0, 1, 1], [], []>} : vector<8x32xbf16>, vector<32x128xbf16>, vector<8x128xf32> -> vector<8x128xf32>
    %7 = vector.shape_cast %4 : vector<64x128xf32> to vector<8x8x128xf32>
    %8 = vector.shape_cast %6 : vector<8x128xf32> to vector<8x1x128xf32>
    %9 = vector.broadcast %8 : vector<8x1x128xf32> to vector<8x8x128xf32>
    %10 = arith.addf %7, %9 : vector<8x8x128xf32>
    %c0_9 = arith.constant 0 : index
    %c0_10 = arith.constant 0 : index
    %11 = vector.load %arg5[%c0_9, %c0_10] : memref<1x128xf32, #tpu.memory_space<vmem>>, vector<1x128xf32>
    %12 = vector.shape_cast %11 : vector<1x128xf32> to vector<1x1x128xf32>
    %13 = vector.broadcast %12 : vector<1x1x128xf32> to vector<8x8x128xf32>
    %14 = arith.addf %10, %13 : vector<8x8x128xf32>
    %cst_11 = arith.constant 0.000000e+00 : f32
    %15 = vector.broadcast %cst_11 : f32 to vector<8x8x128xf32>
    %16 = arith.maximumf %14, %15 : vector<8x8x128xf32>
    %c0_12 = arith.constant 0 : index
    %c0_13 = arith.constant 0 : index
    %17 = vector.load %arg6[%c0_12, %c0_13] : memref<1x128xf32, #tpu.memory_space<vmem>>, vector<1x128xf32>
    %18 = vector.shape_cast %17 : vector<1x128xf32> to vector<1x1x128xf32>
    %19 = vector.broadcast %18 : vector<1x1x128xf32> to vector<8x8x128xf32>
    %20 = arith.mulf %16, %19 : vector<8x8x128xf32>
    %cst_14 = arith.constant dense<0.000000e+00> : vector<8x8xf32>
    %21 = vector.multi_reduction <add>, %20, %cst_14 [2] : vector<8x8x128xf32> to vector<8x8xf32>
    %cst_15 = arith.constant dense<0xFF800000> : vector<8xf32>
    %22 = vector.multi_reduction <maximumf>, %21, %cst_15 [1] : vector<8x8xf32> to vector<8xf32>
    %23 = vector.shape_cast %22 : vector<8xf32> to vector<8x1xf32>
    %24 = vector.broadcast %23 : vector<8x1xf32> to vector<8x8xf32>
    %25 = arith.subf %21, %24 : vector<8x8xf32>
    %26 = math.exp %25 : vector<8x8xf32>
    %cst_16 = arith.constant dense<0.000000e+00> : vector<8xf32>
    %27 = vector.multi_reduction <add>, %26, %cst_16 [1] : vector<8x8xf32> to vector<8xf32>
    %28 = vector.shape_cast %27 : vector<8xf32> to vector<8x1xf32>
    %29 = tpu.reciprocal %28 {approx = true} : vector<8x1xf32> -> vector<8x1xf32>
    %30 = vector.broadcast %29 : vector<8x1xf32> to vector<8x8xf32>
    %31 = arith.mulf %26, %30 : vector<8x8xf32>
    %32 = arith.extf %0 : vector<8x8x32xbf16> to vector<8x8x32xf32>
    %33 = vector.shape_cast %31 : vector<8x8xf32> to vector<8x8x1xf32>
    %34 = vector.broadcast %33 : vector<8x8x1xf32> to vector<8x8x32xf32>
    %35 = arith.mulf %32, %34 : vector<8x8x32xf32>
    %cst_17 = arith.constant dense<0.000000e+00> : vector<8x32xf32>
    %36 = vector.multi_reduction <add>, %35, %cst_17 [1] : vector<8x8x32xf32> to vector<8x32xf32>
    %c0_18 = arith.constant 0 : index
    %c0_19 = arith.constant 0 : index
    %37 = vector.load %arg7[%c0_18, %c0_19] : memref<8x32xf32, #tpu.memory_space<vmem>>, vector<8x32xf32>
    tpu.vector_store %arg7[%c0_18, %c0_19], %36 {strides = array<i32>} : memref<8x32xf32, #tpu.memory_space<vmem>>, vector<8x32xf32>,
    %c0_20 = arith.constant 0 : index
    %c0_21 = arith.constant 0 : index
    %38 = vector.load %arg8[%c0_20, %c0_21] : memref<8x8xf32, #tpu.memory_space<vmem>>, vector<8x8xf32>
    tpu.vector_store %arg8[%c0_20, %c0_21], %31 {strides = array<i32>} : memref<8x8xf32, #tpu.memory_space<vmem>>, vector<8x8xf32>,
    return
  }
  func.func @transform_0(%arg0: i32) -> (i32, i32) {
    %c0_i32 = arith.constant 0 : i32
    %c0_i32_0 = arith.constant 0 : i32
    return %arg0, %c0_i32 : i32, i32
  }
  func.func @transform_1(%arg0: i32) -> (i32, i32, i32) {
    %c0_i32 = arith.constant 0 : i32
    %c0_i32_0 = arith.constant 0 : i32
    %c0_i32_1 = arith.constant 0 : i32
    return %arg0, %c0_i32, %c0_i32_0 : i32, i32, i32
  }
  func.func @transform_2(%arg0: i32) -> (i32, i32) {
    %c0_i32 = arith.constant 0 : i32
    %c0_i32_0 = arith.constant 0 : i32
    %c0_i32_1 = arith.constant 0 : i32
    return %c0_i32, %c0_i32_0 : i32, i32
  }
  func.func @transform_3(%arg0: i32) -> (i32, i32) {
    %c0_i32 = arith.constant 0 : i32
    %c0_i32_0 = arith.constant 0 : i32
    %c0_i32_1 = arith.constant 0 : i32
    return %c0_i32, %c0_i32_0 : i32, i32
  }
  func.func @transform_4(%arg0: i32) -> (i32, i32) {
    %c0_i32 = arith.constant 0 : i32
    %c0_i32_0 = arith.constant 0 : i32
    %c0_i32_1 = arith.constant 0 : i32
    return %c0_i32, %c0_i32_0 : i32, i32
  }
  func.func @transform_5(%arg0: i32) -> (i32, i32) {
    %c0_i32 = arith.constant 0 : i32
    %c0_i32_0 = arith.constant 0 : i32
    %c0_i32_1 = arith.constant 0 : i32
    return %c0_i32, %c0_i32_0 : i32, i32
  }
  func.func @transform_6(%arg0: i32) -> (i32, i32) {
    %c0_i32 = arith.constant 0 : i32
    %c0_i32_0 = arith.constant 0 : i32
    return %arg0, %c0_i32 : i32, i32
  }
  func.func @transform_7(%arg0: i32) -> (i32, i32) {
    %c0_i32 = arith.constant 0 : i32
    %c0_i32_0 = arith.constant 0 : i32
    return %arg0, %c0_i32 : i32, i32
  }
}

</mosaic_0001>

<bundles_post_ra>
// kernel: tpu_custom_call.1
= control target key start
LH: loop header
LB: loop body
LE: loop exit
PB: predicated region body
PF: predicated region fallthrough
CT: control target
= control target key end

     0   :  { %13 = vsyncpa [#allocation3], 0  ;;  %s1315_s0 = inlined_call_operand.hbm [shape: bf16[8,32], index: 0, kind: input, shape index: {}]   ;;  %s1316_s1 = inlined_call_operand.hbm [shape: bf16[8,8,32], index: 1, kind: input, shape index: {}]   ;;  %s1317_s2 = inlined_call_operand.hbm [shape: bf16[32,128], index: 2, kind: input, shape index: {}]   ;;  %s1318_s3 = inlined_call_operand.hbm [shape: bf16[32,128], index: 3, kind: input, shape index: {}]   ;;  %s1319_s4 = inlined_call_operand.vmem [shape: f32[1,128], index: 4, kind: input, shape index: {}]   ;;  %s1320_s5 = inlined_call_operand.vmem [shape: f32[1,128], index: 5, kind: input, shape index: {}]   ;;  %s1321_s6 = inlined_call_operand.hbm [shape: f32[8,32], index: 6, kind: output, shape index: {0}]   ;;  %s1322_s7 = inlined_call_operand.hbm [shape: f32[8,8], index: 7, kind: output, shape index: {1}]  }
   0x1   :  { %14 = vsyncpa [#allocation6], 0 }
   0x2   :  { %15 = vsyncpa [#allocation9], 0 }
   0x3   :  { %16 = vsyncpa [#allocation4], 0 }
   0x4   :  { %17 = vsyncpa [#allocation12], 0  ;;  %s1085_s24 = smov [#allocation5]  }
   0x5   :  { %s33_s25 = sshll.u32 %s1085_s24, 4  ;;  %s34_s25 = int_to_ptr.vmem [resolvable:$true] %s33_s25 }
   0x6   :  { %s963_s26 = scalar_lea.vmem %s34_s25, 512  ;;  %p968_p1 = scmp.lt.s32.totalorder %s34_s25, %s34_s25 }
   0x7   :  { %p964_p0 = scmp.ne.s32.totalorder %s34_s25, %s963_s26  ;;  %p969_p2 = scmp.lt.s32.totalorder %s963_s26, %s963_s26 }
   0x9   :  { %p970_p3 = por %p969_p2, %p968_p1 }
   0xb   :  { %p971_p4 = pnand %p970_p3, %p964_p0 }
   0xd   :  { %974 = shalt.err (!%p971_p4)
}
   0xe   :  { %s1086_s27 = smov 64   ;;  %s1087_s28 = smov 4  }
   0xf   :  { %39 = dma.hbm_to_vmem [thread:$0]  %s1316_s1, 512, %s34_s25, [#allocation6], %s1086_s27, %s1086_s27, %s1087_s28  }
  0x10   :  { %s1088_s8 = smov [#allocation2]   ;;  %s1089_s10 = smov [#allocation7]  }
  0x11   :  { %s24_s9 = sshll.u32 %s1088_s8, 4  ;;  %s45_s11 = sshll.u32 %s1089_s10, 4  ;;  %s25_s9 = int_to_ptr.vmem [resolvable:$true] %s24_s9  ;;  %s46_s11 = int_to_ptr.vmem [resolvable:$true] %s45_s11 }
  0x12   :  { %s983_s12 = scalar_lea.vmem %s25_s9, 64  ;;  %p988_p6 = scmp.lt.s32.totalorder %s25_s9, %s25_s9 }
  0x13   :  { %p984_p5 = scmp.ne.s32.totalorder %s25_s9, %s983_s12  ;;  %p989_p7 = scmp.lt.s32.totalorder %s983_s12, %s983_s12 }
  0x15   :  { %p990_p8 = por %p989_p7, %p988_p6 }
  0x17   :  { %p991_p9 = pnand %p990_p8, %p984_p5 }
  0x19   :  { %994 = shalt.err (!%p991_p9)
}
  0x1a   :  { %27 = dma.hbm_to_vmem [thread:$0]  %s1315_s0, 64, %s25_s9, [#allocation3]  }
  0x1b   :  { %s1003_s15 = scalar_lea.vmem %s46_s11, 256  ;;  %p1008_p11 = scmp.lt.s32.totalorder %s46_s11, %s46_s11 }
  0x1c   :  { %p1004_p10 = scmp.ne.s32.totalorder %s46_s11, %s1003_s15  ;;  %p1009_p12 = scmp.lt.s32.totalorder %s1003_s15, %s1003_s15 }
  0x1e   :  { %p1010_p13 = por %p1009_p12, %p1008_p11 }
  0x20   :  { %p1011_p0 = pnand %p1010_p13, %p1004_p10 }
  0x22   :  { %1014 = shalt.err (!%p1011_p0)
}
  0x23   :  { %51 = dma.hbm_to_vmem [thread:$0]  %s1317_s2, 256, %s46_s11, [#allocation6], %s1086_s27, %s1086_s27, %s1087_s28  }
  0x24   :  { %s1090_s17 = smov [#allocation8]  }
  0x25   :  { %s57_s18 = sshll.u32 %s1090_s17, 4  ;;  %s58_s18 = int_to_ptr.vmem [resolvable:$true] %s57_s18 }
  0x26   :  { %s1023_s19 = scalar_lea.vmem %s58_s18, 256  ;;  %p1028_p2 = scmp.lt.s32.totalorder %s58_s18, %s58_s18 }
  0x27   :  { %p1024_p1 = scmp.ne.s32.totalorder %s58_s18, %s1023_s19  ;;  %p1029_p3 = scmp.lt.s32.totalorder %s1023_s19, %s1023_s19 }
  0x29   :  { %p1030_p4 = por %p1029_p3, %p1028_p2 }
  0x2b   :  { %p1031_p5 = pnand %p1030_p4, %p1024_p1 }
  0x2d   :  { %1034 = shalt.err (!%p1031_p5)
}
  0x2e   :  { %63 = dma.hbm_to_vmem [thread:$0]  %s1318_s3, 256, %s58_s18, [#allocation9], %s1086_s27, %s1086_s27, %s1087_s28  }
  0x2f   :  { %1075 = dma.done.wait [#allocation3], 64  }
  0x30   :  { %1076 = vsyncadd [#allocation3], 4294967232 }
  0x31   :  { %1077 = dma.done.wait [#allocation6], 768  }
  0x32   :  { %1078 = vsyncadd [#allocation6], 4294966528 }
  0x33   :  { %1079 = dma.done.wait [#allocation9], 256  }
  0x34   :  { %1080 = vsyncadd [#allocation9], 4294967040  ;;  %v1091_v0 = vmov 0.0   ;;  %vm1092_vm0 = vmmov 0   ;;  %v925_v1 = vld [vmem:[#allocation8 + $0x8] sm:$0xff]   ;;  %v926_v2 = vld [vmem:[#allocation7 + $0x8] sm:$0xff]   ;;  %v268_v12 = vlaneseq }
  0x35   :  { %903 = vmatprep.subr.bf16.mxu1 %v1091_v0  ;;  %907 = vmatprep.mubr.msk.bf16.mxu1 %vm1092_vm0, %v1091_v0  ;;  %v927_v3 = vld [vmem:[#allocation8] sm:$0xff]   ;;  %v928_v4 = vld [vmem:[#allocation7] sm:$0xff]   ;;  %v1160_v6 = vld [vmem:[#allocation5 + $0x8] sm:$0xff]   ;;  %vm126_vm1 = vcmask 261120   ;;  %v1093_v10 = vmov 1966171168  }
  0x36   :  { %891 = vmatprep.subr.bf16.mxu0 %v925_v1  ;;  %904 = vmatpush3.bf16.msra.mxu1 %v926_v2  ;;  %v1158_v5 = vld [vmem:[#allocation5] sm:$0xff]   ;;  %v1162_v7 = vld [vmem:[#allocation5 + $0x10] sm:$0xff]   ;;  %v89_v8 = vld [vmem:[#allocation2] sm:$0xf]  ;;  %v266_v11 = vunpack.c.l.s4 %v1093_v10  ;;  %v1176_v14 = vshrl.u32 %v268_v12, 7  ;;  %vm457_vm2 = vcmask 1041409  }
  0x37   :  { %892 = vmatpush3.bf16.msra.mxu0 %v925_v1  ;;  %905 = vmatprep.subr.bf16.mxu1 %v1091_v0  ;;  %v1171_v9 = vld [vmem:[#allocation5 + $0x18] sm:$0xff]   ;;  %vm459_vm3 = vcmask 1042434   ;;  %vm461_vm4 = vcmask 1043459   ;;  %vm463_vm5 = vcmask 1044484   ;;  %vm465_vm6 = vcmask 1045509  }
  0x38   :  { %893 = vmatprep.subr.bf16.mxu0 %v927_v3  ;;  %895 = vmatprep.mubr.msk.bf16.mxu0 %vm126_vm1, %v1158_v5  ;;  %v267_v13 = vunpack.c.0.s8 %v266_v11  ;;  %v1180_v20 = vsub.s32 0, %v1176_v14  ;;  %v880_v37 = vld [vmem:[%s1319_s4] ss:$0 sm:$0xff]  ;;  %vm467_vm7 = vcmask 1046534   ;;  %vm469_vm8 = vcmask 1047559  }
  0x39   :  { %v881_v54 = vld [vmem:[%s1320_s5] ss:$0 sm:$0xff]  ;;  %vm472_vm9 = vcmask 64512   ;;  %s1095_s5 = smov [#allocation11]  }
  0x3a   :  { %906 = vmatpush3.bf16.msra.mxu1 %v928_v4  ;;  %v270_v15 = vsub.s32 %v267_v13, %v1176_v14  ;;  %s852_s22 = sshll.u32 %s1095_s5, 4  ;;  %s853_s22 = int_to_ptr.vmem [resolvable:$true] %s852_s22 }
  0x3b   :  { %894 = vmatpush3.bf16.msra.mxu0 %v927_v3  ;;  %s1035_s23 = scalar_lea.vmem %s853_s22, 128  ;;  %p1040_p7 = scmp.lt.s32.totalorder %s853_s22, %s853_s22 }
  0x3c   :  { %p1036_p6 = scmp.ne.s32.totalorder %s853_s22, %s1035_s23  ;;  %p1041_p8 = scmp.lt.s32.totalorder %s1035_s23, %s1035_s23 }
  0x3d   :  { %908 = vmatmul.mubr.msk.bf16.vlgmr.msra.gmra.mxu1 %vm126_vm1, %v89_v8 }
  0x3e   :  { %896 = vmatmul.mubr.msk.bf16.vlgmr.msra.gmra.mxu0 %vm126_vm1, %v1160_v6  ;;  %p1042_p9 = por %p1041_p8, %p1040_p7 }
  0x3f   :  { %899 = vmatprep.mubr.msk.bf16.mxu0 %vm126_vm1, %v1162_v7 }
  0x40   :  { %p1043_p10 = pnand %p1042_p9, %p1036_p6 }
  0x46   :  { %900 = vmatmul.mubr.msk.bf16.gmra.mxu0 %vm126_vm1, %v1171_v9 }
  0xfd   :  { %v257_v16 = vpop.f32.mrf.mxu1 }
  0xfe   :  { %v897_v17 = vpop.f32.mrf.mxu0  ;;  %v264_v18 = vcombine.high %v257_v16, %v257_v16  ;;  %v271_v19 = vrot.slane %v257_v16, %v270_v15 }
  0xff   :  { %v909_v21 = vpop.f32.mrf.mxu1 }
 0x100   :  { %v173_v22 = vpop.f32.mrf.mxu0  ;;  %v278_v23 = vrot.slane %v264_v18, %v270_v15  ;;  %v279_v24 = vcombine.high %v271_v19, %v271_v19  ;;  %v287_v25 = vrot.slane %v271_v19, %v270_v15 }
 0x101   :  { %v260_v26 = vpop.f32.mrf.mxu1 }
 0x102   :  { %v898_v27 = vpop.f32.mrf.mxu0  ;;  %v280_v28 = vcombine.high %v278_v23, %v278_v23  ;;  %v294_v29 = vrot.slane %v278_v23, %v270_v15  ;;  %v301_v30 = vrot.slane %v279_v24, %v270_v15  ;;  %v309_v31 = vcombine.high %v287_v25, %v287_v25 }
 0x103   :  { %v316_v32 = vrot.slane %v287_v25, %v1180_v20  ;;  %v910_v33 = vpop.f32.mrf.mxu1 }
 0x104   :  { %v176_v34 = vpop.f32.mrf.mxu0  ;;  %v324_v35 = vrot.slane %v309_v31, %v1180_v20  ;;  %v311_v36 = vcombine.high %v301_v30, %v301_v30  ;;  %v320_v38 = vrot.slane %v301_v30, %v1180_v20  ;;  %v310_v39 = vcombine.high %v294_v29, %v294_v29 }
 0x105   :  { %v353_v40 = vadd.f32 %v316_v32, %v173_v22  ;;  %v332_v42 = vrot.slane %v294_v29, %v1180_v20  ;;  %v308_v43 = vrot.slane %v280_v28, %v270_v15 }
 0x106   :  { %v901_v41 = vpop.f32.mrf.mxu0  ;;  %v355_v44 = vadd.f32 %v897_v17, %v324_v35  ;;  %v328_v45 = vrot.slane %v311_v36, %v1180_v20  ;;  %v354_v46 = vadd.f32 %v320_v38, %v176_v34  ;;  %v340_v47 = vrot.slane %v310_v39, %v1180_v20 }
 0x107   :  { %v312_v49 = vcombine.high %v308_v43, %v308_v43  ;;  %v368_v50 = vadd.f32 %v880_v37, %v353_v40  ;;  %v336_v61 = vrot.slane %v308_v43, %v1180_v20 }
 0x108   :  { %v189_v48 = vpop.f32.mrf.mxu0  ;;  %v356_v51 = vadd.f32 %v898_v27, %v328_v45  ;;  %v369_v52 = vadd.f32 %v880_v37, %v354_v46  ;;  %v370_v58 = vadd.f32 %v880_v37, %v355_v44  ;;  %v359_v60 = vadd.f32 %v901_v41, %v340_v47 }
 0x109   :  { %v357_v53 = vadd.f32 %v332_v42, %v189_v48  ;;  %v344_v56 = vrot.slane %v312_v49, %v1180_v20  ;;  %v376_v57 = vmax.f32 %v368_v50, 0.0  ;;  %v424_v27 = vand.u32 127, %v268_v12 }
 0x10a   :  { %v902_v55 = vpop.f32.mrf.mxu0  ;;  %v371_v59 = vadd.f32 %v880_v37, %v356_v51  ;;  %v377_v62 = vmax.f32 %v369_v52, 0.0  ;;  %v378_v2 = vmax.f32 %v370_v58, 0.0  ;;  %v374_v13 = vadd.f32 %v880_v37, %v359_v60 }
 0x10b   :  { %v372_v63 = vadd.f32 %v880_v37, %v357_v53  ;;  %v391_v0 = vmul.f32 %v881_v54, %v376_v57  ;;  %v360_v8 = vadd.f32 %v902_v55, %v344_v56  ;;  %v1198_v29 = vsub.s32 %v424_v27, %v1176_v14 }
 0x10c   :  { %v192_v1 = vpop.f32.mrf.mxu0  ;;  %v379_v4 = vmax.f32 %v371_v59, 0.0  ;;  %v393_v10 = vmul.f32 %v881_v54, %v378_v2  ;;  %v392_v16 = vmul.f32 %v881_v54, %v377_v62  ;;  %v382_v21 = vmax.f32 %v374_v13, 0.0 }
 0x10d   :  { %v358_v3 = vadd.f32 %v336_v61, %v192_v1  ;;  %399 = vadd.xlane.f32.xlu0 %v391_v0  ;;  %v380_v15 = vmax.f32 %v372_v63, 0.0  ;;  %v375_v18 = vadd.f32 %v880_v37, %v360_v8  ;;  %v1094_v52 = vmov 0  }
 0x10e   :  { %403 = vadd.xlane.f32.xlu1 %v393_v10  ;;  %v394_v19 = vmul.f32 %v881_v54, %v379_v4  ;;  %v397_v25 = vmul.f32 %v881_v54, %v382_v21  ;;  %924 = vset.pattern.permute.xlu0 %v1094_v52  ;;  %v483_v53 = vsub.s32 1, %v1176_v14  ;;  %v491_v55 = vsub.s32 3, %v1176_v14 }
 0x10f   :  { %v373_v11 = vadd.f32 %v880_v37, %v358_v3  ;;  %v395_v22 = vmul.f32 %v881_v54, %v380_v15  ;;  %v383_v24 = vmax.f32 %v375_v18, 0.0  ;;  %923 = vset.pattern.permute.xlu1 %v1094_v52  ;;  %v495_v60 = vsub.s32 4, %v1176_v14 }
 0x110   :  { %v499_v3 = vsub.s32 5, %v1176_v14 }
 0x111   :  { %v381_v17 = vmax.f32 %v373_v11, 0.0  ;;  %401 = vadd.xlane.f32.xlu0 %v392_v16  ;;  %v398_v26 = vmul.f32 %v881_v54, %v383_v24  ;;  %v503_v11 = vsub.s32 6, %v1176_v14 }
 0x112   :  { %405 = vadd.xlane.f32.xlu1 %v394_v19 }
 0x113   :  { %v396_v23 = vmul.f32 %v881_v54, %v381_v17  ;;  %v487_v54 = vsub.s32 2, %v1176_v14  ;;  %v507_v17 = vsub.s32 7, %v1176_v14 }
 0x115   :  { %407 = vadd.xlane.f32.xlu0 %v395_v22 }
 0x116   :  { %409 = vadd.xlane.f32.xlu1 %v396_v23 }
 0x119   :  { %411 = vadd.xlane.f32.xlu0 %v397_v25 }
 0x11a   :  { %413 = vadd.xlane.f32.xlu1 %v398_v26 }
 0x196   :  { %v400_v28 = vpop.xlane.xlu0 %399 }
 0x197   :  { %v404_v30 = vpop.xlane.xlu1 %403  ;;  %v428_v32 = vrot.slane %v400_v28, %v1198_v29 }
 0x198   :  { %v436_v34 = vrot.slane %v404_v30, %v1198_v29 }
 0x19a   :  { %v402_v31 = vpop.xlane.xlu0 %401 }
 0x19b   :  { %v432_v33 = vrot.slane %v402_v31, %v1198_v29  ;;  %v406_v35 = vpop.xlane.xlu1 %405 }
 0x19c   :  { %v440_v12 = vrot.slane %v406_v35, %v1198_v29 }
 0x19d   :  { %v458_v36 = vsel %vm457_vm2, %v432_v33, %v428_v32 }
 0x19e   :  { %v460_v37 = vsel %vm459_vm3, %v436_v34, %v458_v36  ;;  %v408_v38 = vpop.xlane.xlu0 %407 }
 0x19f   :  { %v462_v39 = vsel %vm461_vm4, %v440_v12, %v460_v37  ;;  %v444_v40 = vrot.slane %v408_v38, %v1198_v29  ;;  %v410_v41 = vpop.xlane.xlu1 %409 }
 0x1a0   :  { %v448_v43 = vrot.slane %v410_v41, %v1198_v29 }
 0x1a1   :  { %v464_v42 = vsel %vm463_vm5, %v444_v40, %v462_v39 }
 0x1a2   :  { %v412_v44 = vpop.xlane.xlu0 %411  ;;  %v466_v46 = vsel %vm465_vm6, %v448_v43, %v464_v42 }
 0x1a3   :  { %v452_v45 = vrot.slane %v412_v44, %v1198_v29  ;;  %v414_v47 = vpop.xlane.xlu1 %413 }
 0x1a4   :  { %v456_v48 = vrot.slane %v414_v47, %v1198_v29 }
 0x1a5   :  { %v468_v49 = vsel %vm467_vm7, %v452_v45, %v466_v46 }
 0x1a6   :  { %v470_v50 = vsel %vm469_vm8, %v456_v48, %v468_v49 }
 0x1a7   :  { %v473_v51 = vsel %vm472_vm9, %v470_v50, -inf }
 0x1a8   :  { %474 = vmax.xlane.f32.xlu0 %v473_v51 }
 0x231   :  { %v475_v56 = vpop.xlane.xlu0 %474 }
 0x232   :  { %v480_v57 = vrot.slane %v475_v56, %v1180_v20  ;;  %v484_v58 = vrot.slane %v475_v56, %v483_v53  ;;  %v488_v59 = vrot.slane %v475_v56, %v487_v54  ;;  %v492_v61 = vrot.slane %v475_v56, %v491_v55 }
 0x233   :  { %v496_v4 = vrot.slane %v475_v56, %v495_v60  ;;  %v500_v13 = vrot.slane %v475_v56, %v499_v3  ;;  %v504_v18 = vrot.slane %v475_v56, %v503_v11  ;;  %v508_v22 = vrot.slane %v475_v56, %v507_v17 }
 0x234   :  { %v517_v62 = vsub.f32 %v400_v28, %v480_v57  ;;  %v518_v63 = vsub.f32 %v402_v31, %v484_v58  ;;  %v519_v0 = vsub.f32 %v404_v30, %v488_v59  ;;  %v520_v8 = vsub.f32 %v406_v35, %v492_v61 }
 0x235   :  { %v521_v15 = vsub.f32 %v408_v38, %v496_v4  ;;  %v522_v19 = vsub.f32 %v410_v41, %v500_v13  ;;  %v523_v23 = vsub.f32 %v412_v44, %v504_v18  ;;  %v524_v27 = vsub.f32 %v414_v47, %v508_v22 }
 0x236   :  { %v525_v1 = vmul.f32 1.442695, %v517_v62  ;;  %v527_v2 = vmul.f32 1.442695, %v518_v63  ;;  %v529_v10 = vmul.f32 1.442695, %v519_v0 }
 0x237   :  { %v531_v16 = vmul.f32 1.442695, %v520_v8  ;;  %v533_v21 = vmul.f32 1.442695, %v521_v15  ;;  %v535_v24 = vmul.f32 1.442695, %v522_v19 }
 0x238   :  { %937 = vpow2.f32 %v525_v1  ;;  %v537_v28 = vmul.f32 1.442695, %v523_v23  ;;  %v539_v31 = vmul.f32 1.442695, %v524_v27 }
 0x239   :  { %939 = vpow2.f32 %v527_v2 }
 0x23a   :  { %941 = vpow2.f32 %v529_v10 }
 0x23b   :  { %943 = vpow2.f32 %v531_v16 }
 0x23c   :  { %945 = vpow2.f32 %v533_v21 }
 0x23d   :  { %947 = vpow2.f32 %v535_v24 }
 0x23e   :  { %949 = vpow2.f32 %v537_v28 }
 0x23f   :  { %951 = vpow2.f32 %v539_v31  ;;  %v669_v31 = vunpack.c.h.bf16 %v1160_v6 }
 0x245   :  { %v938_v25 = vpop.eup %937 }
 0x246   :  { %v940_v26 = vpop.eup %939  ;;  %550 = vperm.xlu1 %923, %v938_v25  }
 0x247   :  { %553 = vperm.xlu0 %924, %v940_v26   ;;  %v942_v30 = vpop.eup %941 }
 0x248   :  { %v944_v32 = vpop.eup %943 }
 0x249   :  { %v946_v33 = vpop.eup %945 }
 0x24a   :  { %556 = vperm.xlu1 %923, %v942_v30   ;;  %v948_v34 = vpop.eup %947 }
 0x24b   :  { %v950_v35 = vpop.eup %949 }
 0x24c   :  { %v952_v36 = vpop.eup %951 }
 0x24e   :  { %559 = vperm.xlu1 %923, %v944_v32  }
 0x252   :  { %562 = vperm.xlu1 %923, %v946_v33  }
 0x256   :  { %565 = vperm.xlu1 %923, %v948_v34  }
 0x25a   :  { %568 = vperm.xlu1 %923, %v950_v35  }
 0x25e   :  { %571 = vperm.xlu1 %923, %v952_v36  }
 0x2c1   :  { %v551_v12 = vpop.permute.xlu1 %550 }
 0x2c2   :  { %v554_v40 = vpop.permute.xlu0 %553  ;;  %v576_v43 = vrot.slane %v551_v12, %v1198_v29 }
 0x2c3   :  { %v580_v42 = vrot.slane %v554_v40, %v1198_v29 }
 0x2c5   :  { %v557_v37 = vpop.permute.xlu1 %556  ;;  %v605_v48 = vsel %vm457_vm2, %v580_v42, %v576_v43 }
 0x2c6   :  { %v584_v44 = vrot.slane %v557_v37, %v1198_v29 }
 0x2c8   :  { %v606_v50 = vsel %vm459_vm3, %v584_v44, %v605_v48 }
 0x2c9   :  { %v560_v38 = vpop.permute.xlu1 %559 }
 0x2ca   :  { %v588_v45 = vrot.slane %v560_v38, %v1198_v29 }
 0x2cc   :  { %v607_v52 = vsel %vm461_vm4, %v588_v45, %v606_v50  ;;  %v672_v50 = vunpack.c.l.bf16 %v1171_v9 }
 0x2cd   :  { %v563_v39 = vpop.permute.xlu1 %562 }
 0x2ce   :  { %v592_v46 = vrot.slane %v563_v39, %v1198_v29 }
 0x2d0   :  { %v608_v56 = vsel %vm463_vm5, %v592_v46, %v607_v52 }
 0x2d1   :  { %v566_v41 = vpop.permute.xlu1 %565 }
 0x2d2   :  { %v596_v49 = vrot.slane %v566_v41, %v1198_v29 }
 0x2d4   :  { %v609_v58 = vsel %vm465_vm6, %v596_v49, %v608_v56 }
 0x2d5   :  { %v569_v47 = vpop.permute.xlu1 %568 }
 0x2d6   :  { %v600_v51 = vrot.slane %v569_v47, %v1198_v29 }
 0x2d8   :  { %v610_v61 = vsel %vm467_vm7, %v600_v51, %v609_v58 }
 0x2d9   :  { %v572_v57 = vpop.permute.xlu1 %571 }
 0x2da   :  { %v604_v59 = vrot.slane %v572_v57, %v1198_v29 }
 0x2dc   :  { %v611_v62 = vsel %vm469_vm8, %v604_v59, %v610_v61 }
 0x2dd   :  { %v613_v63 = vsel %vm472_vm9, %v611_v62, 0.0 }
 0x2de   :  { %614 = vadd.xlane.f32.xlu1 %v613_v63 }
 0x367   :  { %v615_v0 = vpop.xlane.xlu1 %614 }
 0x368   :  { %953 = vrcp.f32 %v615_v0 }
 0x375   :  { %v954_v1 = vpop.eup %953 }
 0x376   :  { %v621_v2 = vrot.slane %v954_v1, %v1180_v20  ;;  %v625_v8 = vrot.slane %v954_v1, %v483_v53  ;;  %v629_v13 = vrot.slane %v954_v1, %v487_v54  ;;  %v633_v16 = vrot.slane %v954_v1, %v491_v55 }
 0x377   :  { %v637_v19 = vrot.slane %v954_v1, %v495_v60  ;;  %v641_v53 = vrot.slane %v954_v1, %v499_v3  ;;  %v645_v54 = vrot.slane %v954_v1, %v503_v11  ;;  %v649_v55 = vrot.slane %v954_v1, %v507_v17 }
 0x378   :  { %v658_v4 = vmul.f32 %v938_v25, %v621_v2  ;;  %v659_v10 = vmul.f32 %v940_v26, %v625_v8  ;;  %v660_v15 = vmul.f32 %v942_v30, %v629_v13  ;;  %v661_v18 = vmul.f32 %v944_v32, %v633_v16 }
 0x379   :  { %v662_v20 = vmul.f32 %v946_v33, %v637_v19  ;;  %v663_v21 = vmul.f32 %v948_v34, %v641_v53  ;;  %v664_v22 = vmul.f32 %v950_v35, %v645_v54  ;;  %v665_v23 = vmul.f32 %v952_v36, %v649_v55 }
 0x37a   :  { %676 = vperm.xlu0 %924, %v658_v4   ;;  %v667_v60 = vunpack.c.h.bf16 %v1158_v5  ;;  %v666_v25 = vunpack.c.l.bf16 %v1158_v5  ;;  %v668_v3 = vunpack.c.l.bf16 %v1160_v6  ;;  %v670_v35 = vunpack.c.l.bf16 %v1162_v7 }
 0x37b   :  { %v671_v6 = vunpack.c.h.bf16 %v1162_v7  ;;  %v673_v2 = vunpack.c.h.bf16 %v1171_v9 }
 0x37e   :  { %681 = vperm.xlu0 %924, %v659_v10  }
 0x382   :  { %686 = vperm.xlu0 %924, %v660_v15  }
 0x386   :  { %691 = vperm.xlu0 %924, %v661_v18  }
 0x38a   :  { %696 = vperm.xlu0 %924, %v662_v20  }
 0x38e   :  { %701 = vperm.xlu0 %924, %v663_v21  }
 0x392   :  { %706 = vperm.xlu0 %924, %v664_v22  }
 0x396   :  { %711 = vperm.xlu0 %924, %v665_v23  }
 0x3f5   :  { %v677_v24 = vpop.permute.xlu0 %676 }
 0x3f6   :  { %v714_v28 = vmul.f32 %v677_v24, %v666_v25  ;;  %v798_v51 = vrot.slane %v677_v24, %v1198_v29 }
 0x3f8   :  { %v722_v17 = vsel %vm126_vm1, %v714_v28, 0.0 }
 0x3f9   :  { %v682_v26 = vpop.permute.xlu0 %681  ;;  %v723_v36 = vrot.slane %v722_v17, 4 }
 0x3fa   :  { %v715_v27 = vmul.f32 %v682_v26, %v667_v60  ;;  %v802_v48 = vrot.slane %v682_v26, %v1198_v29 }
 0x3fb   :  { %v724_v42 = vadd.f32 %v723_v36, %v722_v17 }
 0x3fc   :  { %v729_v14 = vsel %vm126_vm1, %v715_v27, 0.0  ;;  %v827_v4 = vsel %vm457_vm2, %v802_v48, %v798_v51 }
 0x3fd   :  { %v687_v30 = vpop.permute.xlu0 %686  ;;  %v730_v5 = vrot.slane %v729_v14, 4  ;;  %v725_v7 = vrot.slane %v724_v42, 2 }
 0x3fe   :  { %v716_v11 = vmul.f32 %v687_v30, %v668_v3  ;;  %v806_v56 = vrot.slane %v687_v30, %v1198_v29 }
 0x3ff   :  { %v731_v41 = vadd.f32 %v730_v5, %v729_v14  ;;  %v726_v20 = vadd.f32 %v725_v7, %v724_v42 }
 0x400   :  { %v736_v32 = vsel %vm126_vm1, %v716_v11, 0.0  ;;  %v828_v16 = vsel %vm459_vm3, %v806_v56, %v827_v4 }
 0x401   :  { %v692_v33 = vpop.permute.xlu0 %691  ;;  %v737_v12 = vrot.slane %v736_v32, 4  ;;  %v732_v52 = vrot.slane %v731_v41, 2 }
 0x402   :  { %v717_v34 = vmul.f32 %v692_v33, %v669_v31  ;;  %v810_v59 = vrot.slane %v692_v33, %v1198_v29 }
 0x403   :  { %v738_v43 = vadd.f32 %v737_v12, %v736_v32  ;;  %v733_v15 = vadd.f32 %v732_v52, %v731_v41  ;;  %v727_v32 = vrot.slane %v726_v20, 1 }
 0x404   :  { %v743_v37 = vsel %vm126_vm1, %v717_v34, 0.0  ;;  %v829_v21 = vsel %vm461_vm4, %v810_v59, %v828_v16 }
 0x405   :  { %v744_v38 = vrot.slane %v743_v37, 4  ;;  %v697_v39 = vpop.permute.xlu0 %696  ;;  %v739_v58 = vrot.slane %v738_v43, 2  ;;  %v734_v27 = vrot.slane %v733_v15, 1 }
 0x406   :  { %v718_v40 = vmul.f32 %v697_v39, %v670_v35  ;;  %v814_v63 = vrot.slane %v697_v39, %v1198_v29 }
 0x407   :  { %v745_v45 = vadd.f32 %v744_v38, %v743_v37  ;;  %v740_v53 = vadd.f32 %v739_v58, %v738_v43 }
 0x408   :  { %v750_v44 = vsel %vm126_vm1, %v718_v40, 0.0  ;;  %v830_v22 = vsel %vm463_vm5, %v814_v63, %v829_v21 }
 0x409   :  { %v751_v46 = vrot.slane %v750_v44, 4  ;;  %v702_v47 = vpop.permute.xlu0 %701  ;;  %v746_v62 = vrot.slane %v745_v45, 2  ;;  %v741_v31 = vrot.slane %v740_v53, 1 }
 0x40a   :  { %v719_v49 = vmul.f32 %v702_v47, %v671_v6  ;;  %v818_v10 = vrot.slane %v702_v47, %v1198_v29 }
 0x40b   :  { %v752_v57 = vadd.f32 %v751_v46, %v750_v44  ;;  %v747_v9 = vadd.f32 %v746_v62, %v745_v45 }
 0x40c   :  { %v757_v61 = vsel %vm126_vm1, %v719_v49, 0.0  ;;  %v831_v25 = vsel %vm465_vm6, %v818_v10, %v830_v22 }
 0x40d   :  { %v758_v0 = vrot.slane %v757_v61, 4  ;;  %v707_v1 = vpop.permute.xlu0 %706  ;;  %v753_v8 = vrot.slane %v752_v57, 2  ;;  %v748_v33 = vrot.slane %v747_v9, 1 }
 0x40e   :  { %v720_v13 = vmul.f32 %v707_v1, %v672_v50  ;;  %v822_v19 = vrot.slane %v707_v1, %v1198_v29 }
 0x40f   :  { %v759_v18 = vadd.f32 %v758_v0, %v757_v61  ;;  %v754_v60 = vadd.f32 %v753_v8, %v752_v57 }
 0x410   :  { %v764_v54 = vsel %vm126_vm1, %v720_v13, 0.0  ;;  %v832_v11 = vsel %vm467_vm7, %v822_v19, %v831_v25 }
 0x411   :  { %v760_v55 = vrot.slane %v759_v18, 2  ;;  %v765_v23 = vrot.slane %v764_v54, 4  ;;  %v712_v24 = vpop.permute.xlu0 %711  ;;  %v755_v5 = vrot.slane %v754_v60, 1 }
 0x412   :  { %v721_v26 = vmul.f32 %v712_v24, %v673_v2  ;;  %v826_v3 = vrot.slane %v712_v24, %v1198_v29 }
 0x413   :  { %v761_v28 = vadd.f32 %v760_v55, %v759_v18  ;;  %v766_v30 = vadd.f32 %v765_v23, %v764_v54 }
 0x414   :  { %v771_v14 = vsel %vm126_vm1, %v721_v26, 0.0  ;;  %v833_v17 = vsel %vm469_vm8, %v826_v3, %v832_v11 }
 0x415   :  { %v767_v34 = vrot.slane %v766_v30, 2  ;;  %v772_v35 = vrot.slane %v771_v14, 4  ;;  %835 = vst.msk [vmem:[#allocation11] sm:$0xff] %vm472_vm9, %v833_v17 }
 0x416   :  { %1046 = shalt.err (!%p1043_p10)
}
 0x417   :  { %855 = dma.vmem_to_hbm [thread:$0]  %s853_s22, 128, %s1322_s7, [#allocation12]   ;;  %v735_v29 = vadd.f32 %v734_v27, %v733_v15  ;;  %v762_v36 = vrot.slane %v761_v28, 1  ;;  %v768_v12 = vadd.f32 %v767_v34, %v766_v30  ;;  %v773_v37 = vadd.f32 %v772_v35, %v771_v14 }
 0x418   :  { %v742_v38 = vadd.f32 %v741_v31, %v740_v53  ;;  %v728_v39 = vadd.f32 %v727_v32, %v726_v20  ;;  %v749_v40 = vadd.f32 %v748_v33, %v747_v9  ;;  %v756_v42 = vadd.f32 %v755_v5, %v754_v60  ;;  %s1096_s7 = smov [#allocation10]  }
 0x419   :  { %v769_v6 = vrot.slane %v768_v12, 1  ;;  %v774_v41 = vrot.slane %v773_v37, 2  ;;  %v763_v44 = vadd.f32 %v762_v36, %v761_v28  ;;  %s842_s26 = sshll.u32 %s1096_s7, 4  ;;  %s843_s26 = int_to_ptr.vmem [resolvable:$true] %s842_s26 }
 0x41a   :  { %v786_v43 = vsel %vm457_vm2, %v735_v29, %v728_v39  ;;  %s1055_s27 = scalar_lea.vmem %s843_s26, 128  ;;  %p1060_p12 = scmp.lt.s32.totalorder %s843_s26, %s843_s26 }
 0x41b   :  { %v775_v45 = vadd.f32 %v774_v41, %v773_v37  ;;  %v787_v46 = vsel %vm459_vm3, %v742_v38, %v786_v43  ;;  %v770_v47 = vadd.f32 %v769_v6, %v768_v12  ;;  %p1056_p11 = scmp.ne.s32.totalorder %s843_s26, %s1055_s27  ;;  %p1061_p13 = scmp.lt.s32.totalorder %s1055_s27, %s1055_s27 }
 0x41c   :  { %v788_v49 = vsel %vm461_vm4, %v749_v40, %v787_v46 }
 0x41d   :  { %v776_v48 = vrot.slane %v775_v45, 1  ;;  %v789_v50 = vsel %vm463_vm5, %v756_v42, %v788_v49  ;;  %p1062_p0 = por %p1061_p13, %p1060_p12 }
 0x41e   :  { %v790_v52 = vsel %vm465_vm6, %v763_v44, %v789_v50 }
 0x41f   :  { %v777_v51 = vadd.f32 %v776_v48, %v775_v45  ;;  %v791_v56 = vsel %vm467_vm7, %v770_v47, %v790_v52  ;;  %p1063_p1 = pnand %p1062_p0, %p1056_p11 }
 0x421   :  { %v792_v57 = vsel %vm469_vm8, %v777_v51, %v791_v56 }
 0x422   :  { %794 = vst.msk [vmem:[#allocation10] sm:$0xff] %vm126_vm1, %v792_v57 }
 0x423   :  { %1066 = shalt.err (!%p1063_p1)
}
 0x424   :  { %845 = dma.vmem_to_hbm [thread:$0]  %s843_s26, 128, %s1321_s6, [#allocation4]  }
 0x425   :  { %1081 = dma.done.wait [#allocation4], 128  }
 0x426   :  { %1082 = vsyncadd [#allocation4], 4294967168 }
 0x427   :  { %1083 = dma.done.wait [#allocation12], 128  }
 0x428   :  { %1084 = vsyncadd [#allocation12], 4294967168 }
 0x429   :  { %862 = vsyncpa [#allocation3], 1 }
 0x42a   :  { %863 = vsyncpa [#allocation6], 1 }
 0x42b   :  { %864 = vsyncpa [#allocation9], 1 }
 0x42c   :  { %865 = vsyncpa [#allocation4], 1 }
 0x42d   :  { %866 = vsyncpa [#allocation12], 1 }

</bundles_post_ra>
